<compile_context>
chip_gen: v7x
topology: tpu7x:2x2x1
jax: 0.10.0
libtpu: 0.0.40
codegen_flags: <defaults>
</compile_context>

<pallas_src>
import functools

import jax
import jax.numpy as jnp
from jax.experimental import pallas as pl
from jax.experimental.pallas import tpu as pltpu

LANE = 128


def _round_up(x, m):
    return ((x + m - 1) // m) * m


def actor_critic_kernel(
    state_ref,            # (tb, state_dim)           f32
    w1_ref, b1_ref,       # feature_net layer 0       (state_dim, H) bf16, (1, H) f32
    w2_ref, b2_ref,       # feature_net layer 2       (H, H) bf16,        (1, H) f32
    wh1_ref, bh1_ref,     # fused [actor|critic] L0   (H, H) bf16,        (1, H) f32
    wh2_ref, bh2_ref,     # fused block-diag L2       (H, OUT_PAD) bf16,  (1, OUT_PAD) f32
    out_ref,              # (tb, OUT_PAD) f32 = [mean | value | zeros]
):
    bf16 = jnp.bfloat16
    x = state_ref[...].astype(bf16)

    # feature_net: Linear -> ReLU -> Linear -> ReLU (bf16 MXU, f32 accumulate)
    h = jnp.dot(x, w1_ref[...], preferred_element_type=jnp.float32) + b1_ref[...]
    h = jnp.maximum(h, 0.0)
    h = jnp.dot(h.astype(bf16), w2_ref[...], preferred_element_type=jnp.float32) + b2_ref[...]
    h = jnp.maximum(h, 0.0)

    # fused actor/critic hidden layer: one (H, H) matmul instead of two (H, H/2) matmuls
    ac = jnp.dot(h.astype(bf16), wh1_ref[...], preferred_element_type=jnp.float32) + bh1_ref[...]
    ac = jnp.maximum(ac, 0.0)

    # fused block-diagonal output layer -> single lane-dense store
    out_ref[...] = (
        jnp.dot(ac.astype(bf16), wh2_ref[...], preferred_element_type=jnp.float32) + bh2_ref[...]
    )


def prepare_params(params):
    """One-time (per parameter update) fusion / casting. Keep this OUT of the forward hot path."""
    hidden_dim = params["w1"].shape[1]
    half = params["wa1"].shape[1]
    assert hidden_dim % 2 == 0 and 2 * half == hidden_dim, (
        "head fusion assumes hidden_dim is even and heads use hidden_dim//2")
    action_dim = params["wa2"].shape[1]
    out_pad = max(LANE, _round_up(action_dim + 1, LANE))

    bf16 = jnp.bfloat16
    # layer-1 heads: [wa1 | wc1] -> (H, H)
    wh1 = jnp.concatenate([params["wa1"], params["wc1"]], axis=1)
    bh1 = jnp.concatenate([params["ba1"], params["bc1"]], axis=1)
    # layer-2 heads: block-diag [[wa2, 0], [0, wc2]] padded to (H, out_pad)
    wh2 = jnp.zeros((hidden_dim, out_pad), jnp.float32)
    wh2 = wh2.at[:half, :action_dim].set(params["wa2"])
    wh2 = wh2.at[half:, action_dim:action_dim + 1].set(params["wc2"])
    bh2 = jnp.zeros((1, out_pad), jnp.float32)
    bh2 = bh2.at[:, :action_dim].set(params["ba2"])
    bh2 = bh2.at[:, action_dim:action_dim + 1].set(params["bc2"])

    return dict(
        w1=params["w1"].astype(bf16), b1=params["b1"],
        w2=params["w2"].astype(bf16), b2=params["b2"],
        wh1=wh1.astype(bf16), bh1=bh1,
        wh2=wh2.astype(bf16), bh2=bh2,
        std=jnp.exp(params["logstd"][0]),          # (action_dim,), grid-invariant
    )


@functools.partial(jax.jit, static_argnames=("action_dim", "block_batch"))
def actor_critic_forward(state, prepared, *, action_dim, block_batch=1024):
    """ActorCritic forward. state: (B, state_dim) f32.

    Returns (action_mean (B, action_dim), action_std (action_dim,), value (B, 1)).
    """
    B, state_dim = state.shape
    hidden_dim = prepared["w1"].shape[1]
    out_pad = prepared["wh2"].shape[1]

    # ---- batch tiling: fat tiles, no pad copy, >=2 tiles for v7x's second TensorCore ----
    tb = max(8, min(block_batch, _round_up(pl.cdiv(B, 2), 8)))
    grid = (pl.cdiv(B, tb),)          # partial trailing block handled by Pallas masking

    # ---- advisory cost estimate for the XLA scheduler ----
    flops = 2 * B * (state_dim * hidden_dim + 2 * hidden_dim * hidden_dim
                     + hidden_dim * out_pad)
    bytes_accessed = (
        4 * B * state_dim                                               # state in (f32)
        + 2 * (state_dim * hidden_dim + 2 * hidden_dim * hidden_dim
               + hidden_dim * out_pad)                                  # bf16 weights
        + 4 * (3 * hidden_dim + out_pad)                                # f32 biases
        + 4 * B * out_pad                                               # output slab (f32)
    )
    cost = pl.CostEstimate(flops=flops, transcendentals=0, bytes_accessed=bytes_accessed)

    def full_spec(shape):
        return pl.BlockSpec(shape, lambda i: (0, 0))

    out = pl.pallas_call(
        actor_critic_kernel,
        out_shape=jax.ShapeDtypeStruct((B, out_pad), jnp.float32),
        grid=grid,
        in_specs=[
            pl.BlockSpec((tb, state_dim), lambda i: (i, 0)),   # state (batch-tiled)
            full_spec((state_dim, hidden_dim)),                # w1 (bf16)
            full_spec((1, hidden_dim)),                        # b1
            full_spec((hidden_dim, hidden_dim)),               # w2 (bf16)
            full_spec((1, hidden_dim)),                        # b2
            full_spec((hidden_dim, hidden_dim)),               # wh1 (bf16, fused heads L0)
            full_spec((1, hidden_dim)),                        # bh1
            full_spec((hidden_dim, out_pad)),                  # wh2 (bf16, fused block-diag L2)
            full_spec((1, out_pad)),                           # bh2
        ],
        out_specs=pl.BlockSpec((tb, out_pad), lambda i: (i, 0)),
        compiler_params=pltpu.CompilerParams(
            dimension_semantics=("parallel",)),                # batch tiles across TCs on v7x
        cost_estimate=cost,
    )(
        state,
        prepared["w1"], prepared["b1"],
        prepared["w2"], prepared["b2"],
        prepared["wh1"], prepared["bh1"],
        prepared["wh2"], prepared["bh2"],
    )

    mean = out[:, :action_dim]
    value = out[:, action_dim:action_dim + 1]
    return mean, prepared["std"], value


def init_params(key, state_dim, action_dim, hidden_dim):
    """Deterministic init mimicking PyTorch nn.Linear default (U[-1/sqrt(fan_in), +])."""
    half = hidden_dim // 2

    def linear(key, fan_in, fan_out):
        kw, kb = jax.random.split(key)
        bound = 1.0 / jnp.sqrt(fan_in)
        # stored transposed: (in, out)
        w = jax.random.uniform(kw, (fan_in, fan_out), jnp.float32, -bound, bound)
        b = jax.random.uniform(kb, (1, fan_out), jnp.float32, -bound, bound)
        return w, b

    keys = jax.random.split(key, 6)
    w1, b1 = linear(keys[0], state_dim, hidden_dim)
    w2, b2 = linear(keys[1], hidden_dim, hidden_dim)
    wa1, ba1 = linear(keys[2], hidden_dim, half)
    wa2, ba2 = linear(keys[3], half, action_dim)
    wc1, bc1 = linear(keys[4], hidden_dim, half)
    wc2, bc2 = linear(keys[5], half, 1)
    logstd = jnp.zeros((1, action_dim), jnp.float32)  # nn.Parameter(torch.zeros(action_dim))
    return dict(w1=w1, b1=b1, w2=w2, b2=b2,
                wa1=wa1, ba1=ba1, wa2=wa2, ba2=ba2,
                wc1=wc1, bc1=bc1, wc2=wc2, bc2=bc2,
                logstd=logstd)


def reference_forward(state, p, compute_dtype=jnp.float32):
    """Pure-JAX reference. compute_dtype=bf16 mirrors the kernel's mixed-precision matmuls."""
    relu = lambda x: jnp.maximum(x, 0.0)

    def lin(x, w, b):
        return jnp.dot(x.astype(compute_dtype), w.astype(compute_dtype),
                       preferred_element_type=jnp.float32) + b

    h = relu(lin(state, p["w1"], p["b1"]))
    h = relu(lin(h, p["w2"], p["b2"]))
    a = relu(lin(h, p["wa1"], p["ba1"]))
    mean = lin(a, p["wa2"], p["ba2"])
    c = relu(lin(h, p["wc1"], p["bc1"]))
    value = lin(c, p["wc2"], p["bc2"])
    std = jnp.exp(p["logstd"][0])
    return mean, std, value


if __name__ == "__main__":
    # Small shapes consistent with the module: state_dim=16, action_dim=4, hidden_dim=32.
    B, STATE_DIM, ACTION_DIM, HIDDEN_DIM = 8, 16, 4, 32

    key = jax.random.PRNGKey(0)
    k_params, k_state = jax.random.split(key)
    params = init_params(k_params, STATE_DIM, ACTION_DIM, HIDDEN_DIM)
    prepared = prepare_params(params)                         # once per parameter update
    state = jax.random.normal(k_state, (B, STATE_DIM), jnp.float32)

    mean, std, value = actor_critic_forward(state, prepared, action_dim=ACTION_DIM)
    jax.block_until_ready((mean, std, value))

    assert mean.shape == (B, ACTION_DIM)
    assert std.shape == (ACTION_DIM,)
    assert value.shape == (B, 1)

    # Tight check vs. a bf16-mirrored reference (same quantization as the kernel).
    qm, qs, qv = reference_forward(state, params, compute_dtype=jnp.bfloat16)
    assert jnp.allclose(mean, qm, atol=1e-4)
    assert jnp.allclose(value, qv, atol=1e-4)
    # Loose check vs. the pure-f32 PyTorch-equivalent math (bf16 weight rounding only).
    rm, rs, rv = reference_forward(state, params)
    assert jnp.allclose(mean, rm, atol=5e-2, rtol=5e-2)
    assert jnp.allclose(value, rv, atol=5e-2, rtol=5e-2)
    assert jnp.allclose(std, rs, atol=1e-6)

    # Non-tile-aligned, multi-tile batch path (partial trailing block, no pad copy).
    k_big = jax.random.PRNGKey(7)
    big_state = jax.random.normal(k_big, (300, STATE_DIM), jnp.float32)
    b_mean, b_std, b_value = actor_critic_forward(big_state, prepared,
                                                  action_dim=ACTION_DIM, block_batch=128)
    jax.block_until_ready((b_mean, b_std, b_value))
    bq_mean, _, bq_value = reference_forward(big_state, params, compute_dtype=jnp.bfloat16)
    assert jnp.allclose(b_mean, bq_mean, atol=1e-4)
    assert jnp.allclose(b_value, bq_value, atol=1e-4)

    # TODO(synk): get_action's Normal.rsample/log_prob (stochastic sampling) is host-side
    # RL glue and is not part of the forward() hot path implemented here.
    print("KERNEL_OK")
</pallas_src>

<mosaic_0001>
module attributes {stable_mosaic.version = 11 : i64} {
  func.func @actor_critic_kernel(%arg0: i32, %arg1: memref<8x16xf32, #tpu.memory_space<vmem>>, %arg2: memref<16x32xbf16, #tpu.memory_space<vmem>>, %arg3: memref<1x32xf32, #tpu.memory_space<vmem>>, %arg4: memref<32x32xbf16, #tpu.memory_space<vmem>>, %arg5: memref<1x32xf32, #tpu.memory_space<vmem>>, %arg6: memref<32x32xbf16, #tpu.memory_space<vmem>>, %arg7: memref<1x32xf32, #tpu.memory_space<vmem>>, %arg8: memref<32x128xbf16, #tpu.memory_space<vmem>>, %arg9: memref<1x128xf32, #tpu.memory_space<vmem>>, %arg10: memref<8x128xf32, #tpu.memory_space<vmem>>) attributes {dimension_semantics = [#tpu.dimension_semantics<parallel>], iteration_bounds = array<i64: 1>, scalar_prefetch = 0 : i64, scratch_operands = 0 : i64, tpu.core_type = #tpu.core_type<tc>, window_params = [{transform_indices = @transform_0, window_bounds = array<i64: 8, 16>}, {pipeline_mode = #tpu.pipeline_mode<synchronous>, transform_indices = @transform_1, window_bounds = array<i64: 16, 32>}, {pipeline_mode = #tpu.pipeline_mode<synchronous>, transform_indices = @transform_2, window_bounds = array<i64: 1, 32>}, {pipeline_mode = #tpu.pipeline_mode<synchronous>, transform_indices = @transform_3, window_bounds = array<i64: 32, 32>}, {pipeline_mode = #tpu.pipeline_mode<synchronous>, transform_indices = @transform_4, window_bounds = array<i64: 1, 32>}, {pipeline_mode = #tpu.pipeline_mode<synchronous>, transform_indices = @transform_5, window_bounds = array<i64: 32, 32>}, {pipeline_mode = #tpu.pipeline_mode<synchronous>, transform_indices = @transform_6, window_bounds = array<i64: 1, 32>}, {pipeline_mode = #tpu.pipeline_mode<synchronous>, transform_indices = @transform_7, window_bounds = array<i64: 32, 128>}, {pipeline_mode = #tpu.pipeline_mode<synchronous>, transform_indices = @transform_8, window_bounds = array<i64: 1, 128>}, {transform_indices = @transform_9, window_bounds = array<i64: 8, 128>}]} {
    %c0 = arith.constant 0 : index
    %c0_0 = arith.constant 0 : index
    %0 = vector.load %arg1[%c0, %c0_0] : memref<8x16xf32, #tpu.memory_space<vmem>>, vector<8x16xf32>
    %1 = arith.truncf %0 : vector<8x16xf32> to vector<8x16xbf16>
    %c0_1 = arith.constant 0 : index
    %c0_2 = arith.constant 0 : index
    %2 = vector.load %arg2[%c0_1, %c0_2] : memref<16x32xbf16, #tpu.memory_space<vmem>>, vector<16x32xbf16>
    %cst = arith.constant dense<0.000000e+00> : vector<8x32xf32>
    %3 = tpu.matmul %1, %2, %cst {dimension_numbers = #tpu.dot_dimension_numbers<[1], [0], [0], [1], [0, 0, 1, 1], [], []>} : vector<8x16xbf16>, vector<16x32xbf16>, vector<8x32xf32> -> vector<8x32xf32>
    %c0_3 = arith.constant 0 : index
    %c0_4 = arith.constant 0 : index
    %4 = vector.load %arg3[%c0_3, %c0_4] : memref<1x32xf32, #tpu.memory_space<vmem>>, vector<1x32xf32>
    %5 = vector.broadcast %4 : vector<1x32xf32> to vector<8x32xf32>
    %6 = arith.addf %3, %5 : vector<8x32xf32>
    %cst_5 = arith.constant 0.000000e+00 : f32
    %7 = vector.broadcast %cst_5 : f32 to vector<8x32xf32>
    %8 = arith.maximumf %6, %7 : vector<8x32xf32>
    %9 = arith.truncf %8 : vector<8x32xf32> to vector<8x32xbf16>
    %c0_6 = arith.constant 0 : index
    %c0_7 = arith.constant 0 : index
    %10 = vector.load %arg4[%c0_6, %c0_7] : memref<32x32xbf16, #tpu.memory_space<vmem>>, vector<32x32xbf16>
    %cst_8 = arith.constant dense<0.000000e+00> : vector<8x32xf32>
    %11 = tpu.matmul %9, %10, %cst_8 {dimension_numbers = #tpu.dot_dimension_numbers<[1], [0], [0], [1], [0, 0, 1, 1], [], []>} : vector<8x32xbf16>, vector<32x32xbf16>, vector<8x32xf32> -> vector<8x32xf32>
    %c0_9 = arith.constant 0 : index
    %c0_10 = arith.constant 0 : index
    %12 = vector.load %arg5[%c0_9, %c0_10] : memref<1x32xf32, #tpu.memory_space<vmem>>, vector<1x32xf32>
    %13 = vector.broadcast %12 : vector<1x32xf32> to vector<8x32xf32>
    %14 = arith.addf %11, %13 : vector<8x32xf32>
    %cst_11 = arith.constant 0.000000e+00 : f32
    %15 = vector.broadcast %cst_11 : f32 to vector<8x32xf32>
    %16 = arith.maximumf %14, %15 : vector<8x32xf32>
    %17 = arith.truncf %16 : vector<8x32xf32> to vector<8x32xbf16>
    %c0_12 = arith.constant 0 : index
    %c0_13 = arith.constant 0 : index
    %18 = vector.load %arg6[%c0_12, %c0_13] : memref<32x32xbf16, #tpu.memory_space<vmem>>, vector<32x32xbf16>
    %cst_14 = arith.constant dense<0.000000e+00> : vector<8x32xf32>
    %19 = tpu.matmul %17, %18, %cst_14 {dimension_numbers = #tpu.dot_dimension_numbers<[1], [0], [0], [1], [0, 0, 1, 1], [], []>} : vector<8x32xbf16>, vector<32x32xbf16>, vector<8x32xf32> -> vector<8x32xf32>
    %c0_15 = arith.constant 0 : index
    %c0_16 = arith.constant 0 : index
    %20 = vector.load %arg7[%c0_15, %c0_16] : memref<1x32xf32, #tpu.memory_space<vmem>>, vector<1x32xf32>
    %21 = vector.broadcast %20 : vector<1x32xf32> to vector<8x32xf32>
    %22 = arith.addf %19, %21 : vector<8x32xf32>
    %cst_17 = arith.constant 0.000000e+00 : f32
    %23 = vector.broadcast %cst_17 : f32 to vector<8x32xf32>
    %24 = arith.maximumf %22, %23 : vector<8x32xf32>
    %25 = arith.truncf %24 : vector<8x32xf32> to vector<8x32xbf16>
    %c0_18 = arith.constant 0 : index
    %c0_19 = arith.constant 0 : index
    %26 = vector.load %arg8[%c0_18, %c0_19] : memref<32x128xbf16, #tpu.memory_space<vmem>>, vector<32x128xbf16>
    %cst_20 = arith.constant dense<0.000000e+00> : vector<8x128xf32>
    %27 = tpu.matmul %25, %26, %cst_20 {dimension_numbers = #tpu.dot_dimension_numbers<[1], [0], [0], [1], [0, 0, 1, 1], [], []>} : vector<8x32xbf16>, vector<32x128xbf16>, vector<8x128xf32> -> vector<8x128xf32>
    %c0_21 = arith.constant 0 : index
    %c0_22 = arith.constant 0 : index
    %28 = vector.load %arg9[%c0_21, %c0_22] : memref<1x128xf32, #tpu.memory_space<vmem>>, vector<1x128xf32>
    %29 = vector.broadcast %28 : vector<1x128xf32> to vector<8x128xf32>
    %30 = arith.addf %27, %29 : vector<8x128xf32>
    %c0_23 = arith.constant 0 : index
    %c0_24 = arith.constant 0 : index
    %31 = vector.load %arg10[%c0_23, %c0_24] : memref<8x128xf32, #tpu.memory_space<vmem>>, vector<8x128xf32>
    tpu.vector_store %arg10[%c0_23, %c0_24], %30 {strides = array<i32>} : memref<8x128xf32, #tpu.memory_space<vmem>>, vector<8x128xf32>,
    return
  }
  func.func @transform_0(%arg0: i32) -> (i32, i32) {
    %c0_i32 = arith.constant 0 : i32
    %c0_i32_0 = arith.constant 0 : i32
    return %arg0, %c0_i32 : i32, i32
  }
  func.func @transform_1(%arg0: i32) -> (i32, i32) {
    %c0_i32 = arith.constant 0 : i32
    %c0_i32_0 = arith.constant 0 : i32
    %c0_i32_1 = arith.constant 0 : i32
    return %c0_i32, %c0_i32_0 : i32, i32
  }
  func.func @transform_2(%arg0: i32) -> (i32, i32) {
    %c0_i32 = arith.constant 0 : i32
    %c0_i32_0 = arith.constant 0 : i32
    %c0_i32_1 = arith.constant 0 : i32
    return %c0_i32, %c0_i32_0 : i32, i32
  }
  func.func @transform_3(%arg0: i32) -> (i32, i32) {
    %c0_i32 = arith.constant 0 : i32
    %c0_i32_0 = arith.constant 0 : i32
    %c0_i32_1 = arith.constant 0 : i32
    return %c0_i32, %c0_i32_0 : i32, i32
  }
  func.func @transform_4(%arg0: i32) -> (i32, i32) {
    %c0_i32 = arith.constant 0 : i32
    %c0_i32_0 = arith.constant 0 : i32
    %c0_i32_1 = arith.constant 0 : i32
    return %c0_i32, %c0_i32_0 : i32, i32
  }
  func.func @transform_5(%arg0: i32) -> (i32, i32) {
    %c0_i32 = arith.constant 0 : i32
    %c0_i32_0 = arith.constant 0 : i32
    %c0_i32_1 = arith.constant 0 : i32
    return %c0_i32, %c0_i32_0 : i32, i32
  }
  func.func @transform_6(%arg0: i32) -> (i32, i32) {
    %c0_i32 = arith.constant 0 : i32
    %c0_i32_0 = arith.constant 0 : i32
    %c0_i32_1 = arith.constant 0 : i32
    return %c0_i32, %c0_i32_0 : i32, i32
  }
  func.func @transform_7(%arg0: i32) -> (i32, i32) {
    %c0_i32 = arith.constant 0 : i32
    %c0_i32_0 = arith.constant 0 : i32
    %c0_i32_1 = arith.constant 0 : i32
    return %c0_i32, %c0_i32_0 : i32, i32
  }
  func.func @transform_8(%arg0: i32) -> (i32, i32) {
    %c0_i32 = arith.constant 0 : i32
    %c0_i32_0 = arith.constant 0 : i32
    %c0_i32_1 = arith.constant 0 : i32
    return %c0_i32, %c0_i32_0 : i32, i32
  }
  func.func @transform_9(%arg0: i32) -> (i32, i32) {
    %c0_i32 = arith.constant 0 : i32
    %c0_i32_0 = arith.constant 0 : i32
    return %arg0, %c0_i32 : i32, i32
  }
}

</mosaic_0001>

<bundles_post_ra>
// kernel: actor_critic_forward.1
= control target key start
LH: loop header
LB: loop body
LE: loop exit
PB: predicated region body
PF: predicated region fallthrough
CT: control target
= control target key end

     0   :  { %14 = vsyncpa [#allocation3], 0  ;;  %s665_s0 = inlined_call_operand.hbm [shape: f32[8,16], index: 0, kind: input, shape index: {}]   ;;  %s666_s1 = inlined_call_operand.vmem [shape: bf16[16,32], index: 1, kind: input, shape index: {}]   ;;  %s667_s2 = inlined_call_operand.vmem [shape: f32[1,32], index: 2, kind: input, shape index: {}]   ;;  %s668_s3 = inlined_call_operand.hbm [shape: bf16[32,32], index: 3, kind: input, shape index: {}]   ;;  %s669_s4 = inlined_call_operand.vmem [shape: f32[1,32], index: 4, kind: input, shape index: {}]   ;;  %s670_s5 = inlined_call_operand.hbm [shape: bf16[32,32], index: 5, kind: input, shape index: {}]   ;;  %s671_s6 = inlined_call_operand.vmem [shape: f32[1,32], index: 6, kind: input, shape index: {}]   ;;  %s672_s7 = inlined_call_operand.hbm [shape: bf16[32,128], index: 7, kind: input, shape index: {}]   ;;  %s673_s8 = inlined_call_operand.vmem [shape: f32[1,128], index: 8, kind: input, shape index: {}]   ;;  %s674_s9 = inlined_call_operand.vmem [shape: f32[8,128], index: 9, kind: output, shape index: {}]  }
   0x1   :  { %15 = vsyncpa [#allocation5], 0 }
   0x2   :  { %16 = vsyncpa [#allocation8], 0  ;;  %s525_s30 = smov [#allocation4]   ;;  %s431_s13 = scalar_lea.hbm %s668_s3, 256 }
   0x3   :  { %s36_s10 = sshll.u32 %s525_s30, 4  ;;  %p432_p0 = scmp.ne.s32.totalorder %s668_s3, %s431_s13  ;;  %s37_s10 = int_to_ptr.vmem [resolvable:$true] %s36_s10 }
   0x4   :  { %p435_p1 = scmp.lt.u32.totalorder %s431_s13, %s668_s3 }
   0x6   :  { %p437_p2 = pnand %p435_p1, %p432_p0 }
   0x8   :  { %440 = shalt.err (!%p437_p2)
}
   0x9   :  { %s441_s18 = scalar_lea.vmem %s37_s10, 256  ;;  %p446_p4 = scmp.lt.s32.totalorder %s37_s10, %s37_s10 }
   0xa   :  { %p442_p3 = scmp.ne.s32.totalorder %s37_s10, %s441_s18  ;;  %p447_p5 = scmp.lt.s32.totalorder %s441_s18, %s441_s18 }
   0xc   :  { %p448_p6 = por %p447_p5, %p446_p4 }
   0xe   :  { %p449_p7 = pnand %p448_p6, %p442_p3 }
  0x10   :  { %452 = shalt.err (!%p449_p7)
}
  0x11   :  { %s526_s19 = smov 64   ;;  %s527_s20 = smov 4  }
  0x12   :  { %42 = dma.hbm_to_vmem [thread:$0]  %s668_s3, 256, %s37_s10, [#allocation5], %s526_s19, %s526_s19, %s527_s20  }
  0x13   :  { %s528_s23 = smov [#allocation2]   ;;  %s529_s25 = smov [#allocation6]  }
  0x14   :  { %s23_s24 = sshll.u32 %s528_s23, 4  ;;  %s50_s26 = sshll.u32 %s529_s25, 4  ;;  %s24_s24 = int_to_ptr.vmem [resolvable:$true] %s23_s24  ;;  %s51_s26 = int_to_ptr.vmem [resolvable:$true] %s50_s26 }
  0x15   :  { %s453_s29 = scalar_lea.hbm %s665_s0, 128 }
  0x16   :  { %p454_p8 = scmp.ne.s32.totalorder %s665_s0, %s453_s29  ;;  %p457_p9 = scmp.lt.u32.totalorder %s453_s29, %s665_s0 }
  0x18   :  { %p459_p10 = pnand %p457_p9, %p454_p8 }
  0x1a   :  { %462 = shalt.err (!%p459_p10)
}
  0x1b   :  { %s463_s3 = scalar_lea.vmem %s24_s24, 128  ;;  %p468_p12 = scmp.lt.s32.totalorder %s24_s24, %s24_s24 }
  0x1c   :  { %p464_p11 = scmp.ne.s32.totalorder %s24_s24, %s463_s3  ;;  %p469_p13 = scmp.lt.s32.totalorder %s463_s3, %s463_s3 }
  0x1e   :  { %p470_p0 = por %p469_p13, %p468_p12 }
  0x20   :  { %p471_p1 = pnand %p470_p0, %p464_p11 }
  0x22   :  { %474 = shalt.err (!%p471_p1)
}
  0x23   :  { %26 = dma.hbm_to_vmem [thread:$0]  %s665_s0, 128, %s24_s24, [#allocation3]  }
  0x24   :  { %s475_s17 = scalar_lea.hbm %s670_s5, 256 }
  0x25   :  { %p476_p2 = scmp.ne.s32.totalorder %s670_s5, %s475_s17  ;;  %p479_p3 = scmp.lt.u32.totalorder %s475_s17, %s670_s5 }
  0x27   :  { %p481_p4 = pnand %p479_p3, %p476_p2 }
  0x29   :  { %484 = shalt.err (!%p481_p4)
}
  0x2a   :  { %s485_s25 = scalar_lea.vmem %s51_s26, 256  ;;  %p490_p6 = scmp.lt.s32.totalorder %s51_s26, %s51_s26 }
  0x2b   :  { %p486_p5 = scmp.ne.s32.totalorder %s51_s26, %s485_s25  ;;  %p491_p7 = scmp.lt.s32.totalorder %s485_s25, %s485_s25 }
  0x2d   :  { %p492_p8 = por %p491_p7, %p490_p6 }
  0x2f   :  { %p493_p9 = pnand %p492_p8, %p486_p5 }
  0x31   :  { %496 = shalt.err (!%p493_p9)
}
  0x32   :  { %56 = dma.hbm_to_vmem [thread:$0]  %s670_s5, 256, %s51_s26, [#allocation5], %s526_s19, %s526_s19, %s527_s20  }
  0x33   :  { %s530_s27 = smov [#allocation7]   ;;  %s497_s11 = scalar_lea.hbm %s672_s7, 256 }
  0x34   :  { %s64_s28 = sshll.u32 %s530_s27, 4  ;;  %p498_p10 = scmp.ne.s32.totalorder %s672_s7, %s497_s11  ;;  %s65_s28 = int_to_ptr.vmem [resolvable:$true] %s64_s28 }
  0x35   :  { %p501_p11 = scmp.lt.u32.totalorder %s497_s11, %s672_s7 }
  0x37   :  { %p503_p12 = pnand %p501_p11, %p498_p10 }
  0x39   :  { %506 = shalt.err (!%p503_p12)
}
  0x3a   :  { %s507_s14 = scalar_lea.vmem %s65_s28, 256  ;;  %p512_p0 = scmp.lt.s32.totalorder %s65_s28, %s65_s28 }
  0x3b   :  { %p508_p13 = scmp.ne.s32.totalorder %s65_s28, %s507_s14  ;;  %p513_p1 = scmp.lt.s32.totalorder %s507_s14, %s507_s14 }
  0x3d   :  { %p514_p2 = por %p513_p1, %p512_p0 }
  0x3f   :  { %p515_p3 = pnand %p514_p2, %p508_p13 }
  0x41   :  { %518 = shalt.err (!%p515_p3)
}
  0x42   :  { %70 = dma.hbm_to_vmem [thread:$0]  %s672_s7, 256, %s65_s28, [#allocation8], %s526_s19, %s526_s19, %s527_s20  }
  0x43   :  { %519 = dma.done.wait [#allocation3], 128  }
  0x44   :  { %520 = vsyncadd [#allocation3], 4294967168 }
  0x45   :  { %521 = dma.done.wait [#allocation5], 512  }
  0x46   :  { %522 = vsyncadd [#allocation5], 4294966784 }
  0x47   :  { %523 = dma.done.wait [#allocation8], 256  }
  0x48   :  { %524 = vsyncadd [#allocation8], 4294967040  ;;  %v531_v0 = vmov 0.0   ;;  %vm532_vm0 = vmmov 0   ;;  %v424_v1 = vld [vmem:[%s666_s1] sm:$0xff]   ;;  %vm103_vm1 = vcmask 130048  }
  0x49   :  { %386 = vmatprep.subr.bf16.mxu0 %v531_v0  ;;  %388 = vmatprep.mubr.msk.bf16.mxu0 %vm532_vm0, %v531_v0  ;;  %v86_v2 = vld [vmem:[#allocation2] sm:$0xff]  ;;  %v425_v4 = vld [vmem:[#allocation4] sm:$0xff]   ;;  %v426_v5 = vld [vmem:[#allocation4 + $0x8] sm:$0xff]   ;;  %vm172_vm2 = vcmask 261120  }
  0x4a   :  { %392 = vmatprep.subr.bf16.mxu1 %v531_v0  ;;  %396 = vmatprep.mubr.msk.bf16.mxu1 %vm532_vm0, %v531_v0  ;;  %v87_v3 = vpack.c.bf16 %v86_v2, %v86_v2  ;;  %v427_v6 = vld [vmem:[#allocation6] sm:$0xff]   ;;  %v360_v7 = vld [vmem:[%s667_s2] ss:$0 sm:$0xff]  ;;  %v429_v16 = vld [vmem:[#allocation7] sm:$0xff]  }
  0x4b   :  { %387 = vmatpush3.bf16.msra.mxu0 %v424_v1  ;;  %393 = vmatpush3.bf16.msra.mxu1 %v425_v4  ;;  %v428_v15 = vld [vmem:[#allocation6 + $0x8] sm:$0xff]   ;;  %v430_v25 = vld [vmem:[#allocation7 + $0x8] sm:$0xff]  }
  0x4c   :  { %400 = vmatprep.subr.bf16.mxu0 %v531_v0  ;;  %394 = vmatprep.subr.bf16.mxu1 %v531_v0  ;;  %v363_v17 = vld [vmem:[%s669_s4] ss:$0 sm:$0xff] }
  0x4d   :  { %v367_v26 = vld [vmem:[%s671_s6] ss:$0 sm:$0xff] }
  0x4e   :  { %389 = vmatmul.mubr.msk.bf16.vlgmr.msra.gmra.mrb[0].mxu0 %vm103_vm1, %v87_v3  ;;  %v371_v34 = vld [vmem:[%s673_s8] ss:$0 sm:$0xff] }
  0x4f   :  { %404 = vmatprep.mubr.msk.bf16.mxu0 %vm532_vm0, %v531_v0  ;;  %395 = vmatpush3.bf16.msra.mxu1 %v426_v5 }
  0x50   :  { %408 = vmatprep.subr.bf16.mxu1 %v531_v0  ;;  %401 = vmatpush3.bf16.msra.mxu0 %v427_v6 }
  0x51   :  { %402 = vmatprep.subr.bf16.mxu0 %v531_v0 }
  0x54   :  { %403 = vmatpush3.bf16.msra.mxu0 %v428_v15 }
 0x121   :  { %v141_v8 = vpop.f32.mrb[0].mxu0 }
 0x122   :  { %v142_v9 = vadd.f32 %v360_v7, %v141_v8  ;;  %v390_v10 = vpop.f32.mrb[1].mxu0 }
 0x123   :  { %v144_v11 = vpop.f32.mrb[2].mxu0 }
 0x124   :  { %v147_v12 = vmax.f32 %v142_v9, 0.0  ;;  %v391_v13 = vpop.f32.mrb[3].mxu0 }
 0x126   :  { %v148_v14 = vpack.c.bf16 %v147_v12, %v147_v12 }
 0x128   :  { %397 = vmatmul.mubr.msk.bf16.vlgmr.msra.gmra.mrb[0].mxu1 %vm172_vm2, %v148_v14 }
 0x129   :  { %412 = vmatprep.mubr.msk.bf16.mxu1 %vm532_vm0, %v531_v0  ;;  %409 = vmatpush3.bf16.msra.mxu1 %v429_v16 }
 0x12a   :  { %410 = vmatprep.subr.bf16.mxu1 %v531_v0 }
 0x12d   :  { %411 = vmatpush3.bf16.msra.mxu1 %v430_v25 }
 0x1fb   :  { %v210_v18 = vpop.f32.mrb[0].mxu1 }
 0x1fc   :  { %v211_v19 = vadd.f32 %v363_v17, %v210_v18  ;;  %v398_v20 = vpop.f32.mrb[1].mxu1 }
 0x1fd   :  { %v213_v21 = vpop.f32.mrb[2].mxu1 }
 0x1fe   :  { %v216_v22 = vmax.f32 %v211_v19, 0.0  ;;  %v399_v23 = vpop.f32.mrb[3].mxu1 }
 0x200   :  { %v217_v24 = vpack.c.bf16 %v216_v22, %v216_v22 }
 0x202   :  { %405 = vmatmul.mubr.msk.bf16.vlgmr.msra.gmra.mrb[4].mxu0 %vm172_vm2, %v217_v24 }
 0x2d5   :  { %v278_v27 = vpop.f32.mrb[4].mxu0 }
 0x2d6   :  { %v279_v28 = vadd.f32 %v367_v26, %v278_v27  ;;  %v406_v29 = vpop.f32.mrb[5].mxu0 }
 0x2d7   :  { %v281_v30 = vpop.f32.mrb[6].mxu0 }
 0x2d8   :  { %v284_v31 = vmax.f32 %v279_v28, 0.0  ;;  %v407_v32 = vpop.f32.mrb[7].mxu0 }
 0x2da   :  { %v285_v33 = vpack.c.bf16 %v284_v31, %v284_v31 }
 0x2dc   :  { %413 = vmatmul.mubr.msk.bf16.vlgmr.msra.gmra.mrb[4].mxu1 %vm172_vm2, %v285_v33 }
 0x3af   :  { %v346_v35 = vpop.f32.mrb[4].mxu1 }
 0x3b0   :  { %v347_v36 = vadd.f32 %v371_v34, %v346_v35  ;;  %v414_v37 = vpop.f32.mrb[5].mxu1 }
 0x3b1   :  { %v349_v38 = vpop.f32.mrb[6].mxu1 }
 0x3b2   :  { %352 = vst [vmem:[%s674_s9] sm:$0xff] %v347_v36  ;;  %v415_v39 = vpop.f32.mrb[7].mxu1 }
 0x3b3   :  { %357 = vsyncpa [#allocation3], 1 }
 0x3b4   :  { %358 = vsyncpa [#allocation5], 1 }
 0x3b5   :  { %359 = vsyncpa [#allocation8], 1 }

</bundles_post_ra>
